<compile_context>
chip_gen: v7x
topology: tpu7x:2x2x1
jax: 0.10.0
libtpu: 0.0.40
codegen_flags: <defaults>
</compile_context>

<pallas_src>
import functools

import jax
import jax.numpy as jnp
from jax.experimental import pallas as pl
from jax.experimental.pallas import tpu as pltpu


def _round_up(x, m):
    return ((x + m - 1) // m) * m


# ----------------------------------------------------------------------------
# Kernel: two hidden layers + fused (mu|sigma) head, raw slab out (f32).
# ----------------------------------------------------------------------------
def actor_kernel(x_ref, w1_ref, b1_ref, w2_ref, b2_ref, wh_ref, bh_ref, out_ref):
    cdt = w1_ref.dtype  # MXU input dtype (bf16 in production, f32 for the check)

    # fc1 + ReLU  (f32 accumulation via preferred_element_type)
    h1 = jnp.dot(x_ref[...], w1_ref[...],
                 preferred_element_type=jnp.float32) + b1_ref[...]
    h1 = jnp.maximum(h1, 0.0).astype(cdt)

    # fc2 + ReLU
    h2 = jnp.dot(h1, w2_ref[...],
                 preferred_element_type=jnp.float32) + b2_ref[...]
    h2 = jnp.maximum(h2, 0.0).astype(cdt)

    # Fused mu/sigma head: one lane-dense 128-wide matmul, raw pre-activation out.
    out_ref[...] = jnp.dot(h2, wh_ref[...],
                           preferred_element_type=jnp.float32) + bh_ref[...]


# ----------------------------------------------------------------------------
# One-time parameter preparation (head fusion + optional bf16 cast).
# Call once outside the inference/training loop.
# ----------------------------------------------------------------------------
def prepare_params(params, use_bf16=True):
    hidden = params["w1"].shape[1]
    n_actions = params["wmu"].shape[1]
    head_pad = _round_up(2 * n_actions, 128)  # keep at exactly 128 for small heads

    wh = jnp.zeros((hidden, head_pad), jnp.float32)
    wh = wh.at[:, :n_actions].set(params["wmu"])
    wh = wh.at[:, n_actions:2 * n_actions].set(params["wsg"])
    bh = jnp.zeros((1, head_pad), jnp.float32)
    bh = bh.at[:, :n_actions].set(params["bmu"])
    bh = bh.at[:, n_actions:2 * n_actions].set(params["bsg"])

    wdt = jnp.bfloat16 if use_bf16 else jnp.float32
    return dict(
        w1=params["w1"].astype(wdt), b1=params["b1"],      # biases stay f32
        w2=params["w2"].astype(wdt), b2=params["b2"],
        wh=wh.astype(wdt), bh=bh,
    )


# ----------------------------------------------------------------------------
# Forward wrapper.
# ----------------------------------------------------------------------------
@functools.partial(jax.jit, static_argnames=("n_actions", "block_b"))
def actor_forward(x, prep, n_actions, block_b=2048):
    """x: [B, in_dim] f32. prep: output of prepare_params. Returns (mu, sigma)."""
    B, in_dim = x.shape
    hidden = prep["w1"].shape[1]
    head_pad = prep["wh"].shape[1]
    cdt = prep["w1"].dtype  # compute dtype for MXU inputs

    # Pad batch only to a sublane multiple (8); ragged last tile handled by cdiv grid.
    B_pad = _round_up(B, 8)

    # Tile size: multiple of 8, capped so the grid has >=2 steps when the batch
    # allows it (so "parallel" actually shards across both v7x TensorCores).
    bb = min(block_b, max(8, _round_up(pl.cdiv(B_pad, 2), 8)))
    bb = max(8, (bb // 8) * 8)
    grid = (pl.cdiv(B_pad, bb),)

    x_p = x if B_pad == B else jnp.pad(x, ((0, B_pad - B), (0, 0)))
    x_p = x_p.astype(cdt)  # pre-cast input to the MXU dtype (fused with the pad)

    rep = lambda i: (0, 0)  # grid-invariant weight/bias blocks (DMA'd once)

    z = pl.pallas_call(
        actor_kernel,
        out_shape=jax.ShapeDtypeStruct((B_pad, head_pad), jnp.float32),
        grid_spec=pl.GridSpec(
            grid=grid,
            in_specs=[
                pl.BlockSpec((bb, in_dim), lambda i: (i, 0)),   # x (batch tiled)
                pl.BlockSpec((in_dim, hidden), rep),            # w1
                pl.BlockSpec((1, hidden), rep),                 # b1
                pl.BlockSpec((hidden, hidden), rep),            # w2
                pl.BlockSpec((1, hidden), rep),                 # b2
                pl.BlockSpec((hidden, head_pad), rep),          # fused head W
                pl.BlockSpec((1, head_pad), rep),               # fused head b
            ],
            out_specs=pl.BlockSpec((bb, head_pad), lambda i: (i, 0)),
        ),
        compiler_params=pltpu.CompilerParams(
            dimension_semantics=("parallel",),
        ),
    )(x_p, prep["w1"], prep["b1"], prep["w2"], prep["b2"], prep["wh"], prep["bh"])

    # Head activations only on the n_actions columns actually used (negligible work).
    z = z[:B]
    mu = jnp.tanh(z[:, :n_actions])
    sigma = jnp.logaddexp(z[:, n_actions:2 * n_actions], 0.0)  # stable softplus
    return mu, sigma


# ----------------------------------------------------------------------------
# Parameter init + pure-JAX reference.
# ----------------------------------------------------------------------------
def init_params(key, in_dim, hidden, n_actions):
    """PyTorch-Linear-style init (uniform +-1/sqrt(fan_in)); weights stored [in, out]."""
    ks = jax.random.split(key, 8)

    def linear(kw, kb, fan_in, fan_out):
        bound = 1.0 / jnp.sqrt(fan_in)
        w = jax.random.uniform(kw, (fan_in, fan_out), jnp.float32, -bound, bound)
        b = jax.random.uniform(kb, (1, fan_out), jnp.float32, -bound, bound)
        return w, b

    w1, b1 = linear(ks[0], ks[1], in_dim, hidden)
    w2, b2 = linear(ks[2], ks[3], hidden, hidden)
    wmu, bmu = linear(ks[4], ks[5], hidden, n_actions)
    wsg, bsg = linear(ks[6], ks[7], hidden, n_actions)
    return dict(w1=w1, b1=b1, w2=w2, b2=b2, wmu=wmu, bmu=bmu, wsg=wsg, bsg=bsg)


def reference_forward(x, p):
    h1 = jnp.maximum(x @ p["w1"] + p["b1"], 0.0)
    h2 = jnp.maximum(h1 @ p["w2"] + p["b2"], 0.0)
    mu = jnp.tanh(h2 @ p["wmu"] + p["bmu"])
    sigma = jnp.logaddexp(h2 @ p["wsg"] + p["bsg"], 0.0)
    return mu, sigma


# TODO(synk): optimizer (Adam) / device-placement bits of the PyTorch module are
# training infrastructure, not part of the forward pass, and are not translated.

if __name__ == "__main__":
    # LunarLanderContinuous-v2: observation dim 8, action dim 2.
    B, IN_DIM, HIDDEN, N_ACTIONS = 8, 8, 128, 2

    key = jax.random.PRNGKey(0)
    k_x, k_p, k_x2 = jax.random.split(key, 3)

    x = jax.random.normal(k_x, (B, IN_DIM), dtype=jnp.float32)
    params = init_params(k_p, IN_DIM, HIDDEN, N_ACTIONS)
    mu_ref, sigma_ref = reference_forward(x, params)

    # f32 MXU path: tight correctness check vs pure-JAX reference.
    prep_f32 = prepare_params(params, use_bf16=False)
    mu, sigma = actor_forward(x, prep_f32, N_ACTIONS)
    jax.block_until_ready((mu, sigma))
    assert mu.shape == (B, N_ACTIONS) and sigma.shape == (B, N_ACTIONS)
    assert jnp.allclose(mu, mu_ref, atol=1e-5, rtol=1e-5), "mu mismatch (f32)"
    assert jnp.allclose(sigma, sigma_ref, atol=1e-5, rtol=1e-5), "sigma mismatch (f32)"

    # Production path: bf16 inputs / f32 accumulation (native MXU), looser check.
    prep_bf16 = prepare_params(params, use_bf16=True)
    mu_b, sigma_b = actor_forward(x, prep_bf16, N_ACTIONS)
    jax.block_until_ready((mu_b, sigma_b))
    assert jnp.allclose(mu_b, mu_ref, atol=5e-2, rtol=5e-2), "mu mismatch (bf16)"
    assert jnp.allclose(sigma_b, sigma_ref, atol=5e-2, rtol=5e-2), "sigma mismatch (bf16)"

    # Ragged, multi-step-grid batch (exercises cdiv grid + masked last tile).
    B2 = 200
    x2 = jax.random.normal(k_x2, (B2, IN_DIM), dtype=jnp.float32)
    mu2_ref, sigma2_ref = reference_forward(x2, params)
    mu2, sigma2 = actor_forward(x2, prep_f32, N_ACTIONS)
    jax.block_until_ready((mu2, sigma2))
    assert mu2.shape == (B2, N_ACTIONS) and sigma2.shape == (B2, N_ACTIONS)
    assert jnp.allclose(mu2, mu2_ref, atol=1e-5, rtol=1e-5), "mu mismatch (ragged)"
    assert jnp.allclose(sigma2, sigma2_ref, atol=1e-5, rtol=1e-5), "sigma mismatch (ragged)"

    print("KERNEL_OK")
</pallas_src>

<mosaic_0001>
module attributes {stable_mosaic.version = 11 : i64} {
  func.func @actor_kernel(%arg0: i32, %arg1: memref<8x8xf32, #tpu.memory_space<vmem>>, %arg2: memref<8x128xf32, #tpu.memory_space<vmem>>, %arg3: memref<1x128xf32, #tpu.memory_space<vmem>>, %arg4: memref<128x128xf32, #tpu.memory_space<vmem>>, %arg5: memref<1x128xf32, #tpu.memory_space<vmem>>, %arg6: memref<128x128xf32, #tpu.memory_space<vmem>>, %arg7: memref<1x128xf32, #tpu.memory_space<vmem>>, %arg8: memref<8x128xf32, #tpu.memory_space<vmem>>) attributes {dimension_semantics = [#tpu.dimension_semantics<parallel>], iteration_bounds = array<i64: 1>, scalar_prefetch = 0 : i64, scratch_operands = 0 : i64, tpu.core_type = #tpu.core_type<tc>, window_params = [{transform_indices = @transform_0, window_bounds = array<i64: 8, 8>}, {pipeline_mode = #tpu.pipeline_mode<synchronous>, transform_indices = @transform_1, window_bounds = array<i64: 8, 128>}, {pipeline_mode = #tpu.pipeline_mode<synchronous>, transform_indices = @transform_2, window_bounds = array<i64: 1, 128>}, {pipeline_mode = #tpu.pipeline_mode<synchronous>, transform_indices = @transform_3, window_bounds = array<i64: 128, 128>}, {pipeline_mode = #tpu.pipeline_mode<synchronous>, transform_indices = @transform_4, window_bounds = array<i64: 1, 128>}, {pipeline_mode = #tpu.pipeline_mode<synchronous>, transform_indices = @transform_5, window_bounds = array<i64: 128, 128>}, {pipeline_mode = #tpu.pipeline_mode<synchronous>, transform_indices = @transform_6, window_bounds = array<i64: 1, 128>}, {transform_indices = @transform_7, window_bounds = array<i64: 8, 128>}]} {
    %c0 = arith.constant 0 : index
    %c0_0 = arith.constant 0 : index
    %0 = vector.load %arg1[%c0, %c0_0] : memref<8x8xf32, #tpu.memory_space<vmem>>, vector<8x8xf32>
    %c0_1 = arith.constant 0 : index
    %c0_2 = arith.constant 0 : index
    %1 = vector.load %arg2[%c0_1, %c0_2] : memref<8x128xf32, #tpu.memory_space<vmem>>, vector<8x128xf32>
    %cst = arith.constant dense<0.000000e+00> : vector<8x128xf32>
    %2 = tpu.matmul %0, %1, %cst {dimension_numbers = #tpu.dot_dimension_numbers<[1], [0], [0], [1], [0, 0, 1, 1], [], []>} : vector<8x8xf32>, vector<8x128xf32>, vector<8x128xf32> -> vector<8x128xf32>
    %c0_3 = arith.constant 0 : index
    %c0_4 = arith.constant 0 : index
    %3 = vector.load %arg3[%c0_3, %c0_4] : memref<1x128xf32, #tpu.memory_space<vmem>>, vector<1x128xf32>
    %4 = vector.broadcast %3 : vector<1x128xf32> to vector<8x128xf32>
    %5 = arith.addf %2, %4 : vector<8x128xf32>
    %cst_5 = arith.constant 0.000000e+00 : f32
    %6 = vector.broadcast %cst_5 : f32 to vector<8x128xf32>
    %7 = arith.maximumf %5, %6 : vector<8x128xf32>
    %c0_6 = arith.constant 0 : index
    %c0_7 = arith.constant 0 : index
    %8 = vector.load %arg4[%c0_6, %c0_7] : memref<128x128xf32, #tpu.memory_space<vmem>>, vector<128x128xf32>
    %cst_8 = arith.constant dense<0.000000e+00> : vector<8x128xf32>
    %9 = tpu.matmul %7, %8, %cst_8 {dimension_numbers = #tpu.dot_dimension_numbers<[1], [0], [0], [1], [0, 0, 1, 1], [], []>} : vector<8x128xf32>, vector<128x128xf32>, vector<8x128xf32> -> vector<8x128xf32>
    %c0_9 = arith.constant 0 : index
    %c0_10 = arith.constant 0 : index
    %10 = vector.load %arg5[%c0_9, %c0_10] : memref<1x128xf32, #tpu.memory_space<vmem>>, vector<1x128xf32>
    %11 = vector.broadcast %10 : vector<1x128xf32> to vector<8x128xf32>
    %12 = arith.addf %9, %11 : vector<8x128xf32>
    %cst_11 = arith.constant 0.000000e+00 : f32
    %13 = vector.broadcast %cst_11 : f32 to vector<8x128xf32>
    %14 = arith.maximumf %12, %13 : vector<8x128xf32>
    %c0_12 = arith.constant 0 : index
    %c0_13 = arith.constant 0 : index
    %15 = vector.load %arg6[%c0_12, %c0_13] : memref<128x128xf32, #tpu.memory_space<vmem>>, vector<128x128xf32>
    %cst_14 = arith.constant dense<0.000000e+00> : vector<8x128xf32>
    %16 = tpu.matmul %14, %15, %cst_14 {dimension_numbers = #tpu.dot_dimension_numbers<[1], [0], [0], [1], [0, 0, 1, 1], [], []>} : vector<8x128xf32>, vector<128x128xf32>, vector<8x128xf32> -> vector<8x128xf32>
    %c0_15 = arith.constant 0 : index
    %c0_16 = arith.constant 0 : index
    %17 = vector.load %arg7[%c0_15, %c0_16] : memref<1x128xf32, #tpu.memory_space<vmem>>, vector<1x128xf32>
    %18 = vector.broadcast %17 : vector<1x128xf32> to vector<8x128xf32>
    %19 = arith.addf %16, %18 : vector<8x128xf32>
    %c0_17 = arith.constant 0 : index
    %c0_18 = arith.constant 0 : index
    %20 = vector.load %arg8[%c0_17, %c0_18] : memref<8x128xf32, #tpu.memory_space<vmem>>, vector<8x128xf32>
    tpu.vector_store %arg8[%c0_17, %c0_18], %19 {strides = array<i32>} : memref<8x128xf32, #tpu.memory_space<vmem>>, vector<8x128xf32>,
    return
  }
  func.func @transform_0(%arg0: i32) -> (i32, i32) {
    %c0_i32 = arith.constant 0 : i32
    %c0_i32_0 = arith.constant 0 : i32
    return %arg0, %c0_i32 : i32, i32
  }
  func.func @transform_1(%arg0: i32) -> (i32, i32) {
    %c0_i32 = arith.constant 0 : i32
    %c0_i32_0 = arith.constant 0 : i32
    %c0_i32_1 = arith.constant 0 : i32
    return %c0_i32, %c0_i32_0 : i32, i32
  }
  func.func @transform_2(%arg0: i32) -> (i32, i32) {
    %c0_i32 = arith.constant 0 : i32
    %c0_i32_0 = arith.constant 0 : i32
    %c0_i32_1 = arith.constant 0 : i32
    return %c0_i32, %c0_i32_0 : i32, i32
  }
  func.func @transform_3(%arg0: i32) -> (i32, i32) {
    %c0_i32 = arith.constant 0 : i32
    %c0_i32_0 = arith.constant 0 : i32
    %c0_i32_1 = arith.constant 0 : i32
    return %c0_i32, %c0_i32_0 : i32, i32
  }
  func.func @transform_4(%arg0: i32) -> (i32, i32) {
    %c0_i32 = arith.constant 0 : i32
    %c0_i32_0 = arith.constant 0 : i32
    %c0_i32_1 = arith.constant 0 : i32
    return %c0_i32, %c0_i32_0 : i32, i32
  }
  func.func @transform_5(%arg0: i32) -> (i32, i32) {
    %c0_i32 = arith.constant 0 : i32
    %c0_i32_0 = arith.constant 0 : i32
    %c0_i32_1 = arith.constant 0 : i32
    return %c0_i32, %c0_i32_0 : i32, i32
  }
  func.func @transform_6(%arg0: i32) -> (i32, i32) {
    %c0_i32 = arith.constant 0 : i32
    %c0_i32_0 = arith.constant 0 : i32
    %c0_i32_1 = arith.constant 0 : i32
    return %c0_i32, %c0_i32_0 : i32, i32
  }
  func.func @transform_7(%arg0: i32) -> (i32, i32) {
    %c0_i32 = arith.constant 0 : i32
    %c0_i32_0 = arith.constant 0 : i32
    return %arg0, %c0_i32 : i32, i32
  }
}

</mosaic_0001>

<bundles_post_ra>
// kernel: actor_forward.1
= control target key start
LH: loop header
LB: loop body
LE: loop exit
PB: predicated region body
PF: predicated region fallthrough
CT: control target
= control target key end

     0   :  { %12 = vsyncpa [#allocation3], 0  ;;  %s708_s0 = inlined_call_operand.hbm [shape: f32[8,8], index: 0, kind: input, shape index: {}]   ;;  %s709_s1 = inlined_call_operand.vmem [shape: f32[8,128], index: 1, kind: input, shape index: {}]   ;;  %s710_s2 = inlined_call_operand.vmem [shape: f32[1,128], index: 2, kind: input, shape index: {}]   ;;  %s711_s3 = inlined_call_operand.hbm [shape: f32[128,128], index: 3, kind: input, shape index: {}]   ;;  %s712_s4 = inlined_call_operand.vmem [shape: f32[1,128], index: 4, kind: input, shape index: {}]   ;;  %s713_s5 = inlined_call_operand.hbm [shape: f32[128,128], index: 5, kind: input, shape index: {}]   ;;  %s714_s6 = inlined_call_operand.vmem [shape: f32[1,128], index: 6, kind: input, shape index: {}]   ;;  %s715_s7 = inlined_call_operand.vmem [shape: f32[8,128], index: 7, kind: output, shape index: {}]  }
   0x1   :  { %13 = vsyncpa [#allocation5], 0  ;;  %s584_s24 = smov [#allocation4]   ;;  %s514_s28 = scalar_lea.hbm %s711_s3, 2048 }
   0x2   :  { %s33_s25 = sshll.u32 %s584_s24, 4  ;;  %p515_p0 = scmp.ne.s32.totalorder %s711_s3, %s514_s28  ;;  %s34_s25 = int_to_ptr.vmem [resolvable:$true] %s33_s25 }
   0x3   :  { %p518_p1 = scmp.lt.u32.totalorder %s514_s28, %s711_s3 }
   0x5   :  { %p520_p2 = pnand %p518_p1, %p515_p0 }
   0x7   :  { %523 = shalt.err (!%p520_p2)
}
   0x8   :  { %s524_s10 = scalar_lea.vmem %s34_s25, 2048  ;;  %p529_p4 = scmp.lt.s32.totalorder %s34_s25, %s34_s25 }
   0x9   :  { %p525_p3 = scmp.ne.s32.totalorder %s34_s25, %s524_s10  ;;  %p530_p5 = scmp.lt.s32.totalorder %s524_s10, %s524_s10 }
   0xb   :  { %p531_p6 = por %p530_p5, %p529_p4 }
   0xd   :  { %p532_p7 = pnand %p531_p6, %p525_p3 }
   0xf   :  { %535 = shalt.err (!%p532_p7)
}
  0x10   :  { %s585_s11 = smov 128   ;;  %s586_s12 = smov 8  }
  0x11   :  { %39 = dma.hbm_to_vmem [thread:$0]  %s711_s3, 2048, %s34_s25, [#allocation5], %s585_s11, %s585_s11, %s586_s12  }
  0x12   :  { %s587_s15 = smov [#allocation2]   ;;  %s588_s17 = smov [#allocation6]  }
  0x13   :  { %s20_s16 = sshll.u32 %s587_s15, 4  ;;  %s47_s18 = sshll.u32 %s588_s17, 4  ;;  %s21_s16 = int_to_ptr.vmem [resolvable:$true] %s20_s16  ;;  %s48_s18 = int_to_ptr.vmem [resolvable:$true] %s47_s18 }
  0x14   :  { %s536_s21 = scalar_lea.hbm %s708_s0, 128 }
  0x15   :  { %p537_p8 = scmp.ne.s32.totalorder %s708_s0, %s536_s21  ;;  %p540_p9 = scmp.lt.u32.totalorder %s536_s21, %s708_s0 }
  0x17   :  { %p542_p10 = pnand %p540_p9, %p537_p8 }
  0x19   :  { %545 = shalt.err (!%p542_p10)
}
  0x1a   :  { %s546_s3 = scalar_lea.vmem %s21_s16, 128  ;;  %p551_p12 = scmp.lt.s32.totalorder %s21_s16, %s21_s16 }
  0x1b   :  { %p547_p11 = scmp.ne.s32.totalorder %s21_s16, %s546_s3  ;;  %p552_p13 = scmp.lt.s32.totalorder %s546_s3, %s546_s3 }
  0x1d   :  { %p553_p0 = por %p552_p13, %p551_p12 }
  0x1f   :  { %p554_p1 = pnand %p553_p0, %p547_p11 }
  0x21   :  { %557 = shalt.err (!%p554_p1)
}
  0x22   :  { %23 = dma.hbm_to_vmem [thread:$0]  %s708_s0, 128, %s21_s16, [#allocation3]  }
  0x23   :  { %s558_s30 = scalar_lea.hbm %s713_s5, 2048 }
  0x24   :  { %p559_p2 = scmp.ne.s32.totalorder %s713_s5, %s558_s30  ;;  %p562_p3 = scmp.lt.u32.totalorder %s558_s30, %s713_s5 }
  0x26   :  { %p564_p4 = pnand %p562_p3, %p559_p2 }
  0x28   :  { %567 = shalt.err (!%p564_p4)
}
  0x29   :  { %s568_s14 = scalar_lea.vmem %s48_s18, 2048  ;;  %p573_p6 = scmp.lt.s32.totalorder %s48_s18, %s48_s18 }
  0x2a   :  { %p569_p5 = scmp.ne.s32.totalorder %s48_s18, %s568_s14  ;;  %p574_p7 = scmp.lt.s32.totalorder %s568_s14, %s568_s14 }
  0x2c   :  { %p575_p8 = por %p574_p7, %p573_p6 }
  0x2e   :  { %p576_p9 = pnand %p575_p8, %p569_p5 }
  0x30   :  { %579 = shalt.err (!%p576_p9)
}
  0x31   :  { %53 = dma.hbm_to_vmem [thread:$0]  %s713_s5, 2048, %s48_s18, [#allocation5], %s585_s11, %s585_s11, %s586_s12  }
  0x32   :  { %580 = dma.done.wait [#allocation3], 128  }
  0x33   :  { %581 = vsyncadd [#allocation3], 4294967168 }
  0x34   :  { %582 = dma.done.wait [#allocation5], 4096  }
  0x35   :  { %583 = vsyncadd [#allocation5], 4294963200  ;;  %v589_v0 = vmov 0.0   ;;  %vm590_vm0 = vmmov 0   ;;  %v591_v1 = vmov 0.0|0.0   ;;  %vm74_vm1 = vcmask 64512  }
  0x36   :  { %383 = vmatprep.subr.mxu0 %v589_v0  ;;  %385 = vmatprep.mubr.msk.f32.mxu0 %vm590_vm0, %v589_v0  ;;  %v66_v2 = vld [vmem:[%s709_s1] sm:$0xff]  ;;  %v149_v4 = vld [vmem:[#allocation4] sm:$0xff]  ;;  %v150_v5 = vld [vmem:[#allocation4 + $0x8] sm:$0xff] }
  0x37   :  { %458 = vmatprep.subr.bf16.mxu1 %v591_v1  ;;  %420 = vmatprep.mubr.msk.f32.mxu1 %vm590_vm0, %v589_v0  ;;  %v65_v3 = vld [vmem:[#allocation2] sm:$0xff]  ;;  %v151_v6 = vld [vmem:[#allocation4 + $0x10] sm:$0xff]  ;;  %v459_v8 = vpack.c.bf16 %v150_v5, %v149_v4  ;;  %v153_v10 = vld [vmem:[#allocation4 + $0x20] sm:$0xff] }
  0x38   :  { %384 = vmatpush3.msra.mxu0 %v66_v2  ;;  %v152_v7 = vld [vmem:[#allocation4 + $0x18] sm:$0xff]  ;;  %v154_v11 = vld [vmem:[#allocation4 + $0x28] sm:$0xff]  ;;  %v155_v13 = vld [vmem:[#allocation4 + $0x30] sm:$0xff] }
  0x39   :  { %386 = vmatmul.mubr.msk.f32.vlgmr.msra.gmra.mrb[0].mxu0 %vm74_vm1, %v65_v3  ;;  %482 = vmatprep.subr.bf16.mxu0 %v591_v1  ;;  %v462_v9 = vpack.c.bf16 %v152_v7, %v151_v6  ;;  %v465_v12 = vpack.c.bf16 %v154_v11, %v153_v10  ;;  %v156_v14 = vld [vmem:[#allocation4 + $0x38] sm:$0xff]  ;;  %v157_v16 = vld [vmem:[#allocation4 + $0x40] sm:$0xff]  ;;  %v158_v17 = vld [vmem:[#allocation4 + $0x48] sm:$0xff] }
  0x3a   :  { %455 = vmatprep.mubr.msk.f32.mxu0 %vm590_vm0, %v589_v0  ;;  %460 = vmatpush3.bf16.msra.mxu1 %v459_v8  ;;  %v468_v15 = vpack.c.bf16 %v156_v14, %v155_v13  ;;  %v471_v18 = vpack.c.bf16 %v158_v17, %v157_v16  ;;  %v159_v19 = vld [vmem:[#allocation4 + $0x50] sm:$0xff]  ;;  %v160_v20 = vld [vmem:[#allocation4 + $0x58] sm:$0xff]  ;;  %v161_v22 = vld [vmem:[#allocation4 + $0x60] sm:$0xff] }
  0x3b   :  { %461 = vmatprep.subr.bf16.mxu1 %v591_v1  ;;  %v474_v21 = vpack.c.bf16 %v160_v20, %v159_v19  ;;  %v162_v23 = vld [vmem:[#allocation4 + $0x68] sm:$0xff]  ;;  %v163_v25 = vld [vmem:[#allocation4 + $0x70] sm:$0xff]  ;;  %v164_v26 = vld [vmem:[#allocation4 + $0x78] sm:$0xff] }
  0x3c   :  { %v477_v24 = vpack.c.bf16 %v162_v23, %v161_v22  ;;  %v480_v27 = vpack.c.bf16 %v164_v26, %v163_v25  ;;  %v243_v28 = vld [vmem:[#allocation6] sm:$0xff]  ;;  %v244_v29 = vld [vmem:[#allocation6 + $0x8] sm:$0xff]  ;;  %v245_v30 = vld [vmem:[#allocation6 + $0x10] sm:$0xff] }
  0x3d   :  { %v483_v31 = vpack.c.bf16 %v244_v29, %v243_v28  ;;  %v246_v32 = vld [vmem:[#allocation6 + $0x18] sm:$0xff]  ;;  %v247_v34 = vld [vmem:[#allocation6 + $0x20] sm:$0xff]  ;;  %v248_v35 = vld [vmem:[#allocation6 + $0x28] sm:$0xff] }
  0x3e   :  { %463 = vmatpush3.bf16.msra.mxu1 %v462_v9  ;;  %v486_v33 = vpack.c.bf16 %v246_v32, %v245_v30  ;;  %v489_v36 = vpack.c.bf16 %v248_v35, %v247_v34  ;;  %v249_v37 = vld [vmem:[#allocation6 + $0x30] sm:$0xff]  ;;  %v250_v38 = vld [vmem:[#allocation6 + $0x38] sm:$0xff]  ;;  %v251_v40 = vld [vmem:[#allocation6 + $0x40] sm:$0xff] }
  0x3f   :  { %464 = vmatprep.subr.bf16.mxu1 %v591_v1  ;;  %484 = vmatpush3.bf16.msra.mxu0 %v483_v31  ;;  %v492_v39 = vpack.c.bf16 %v250_v38, %v249_v37  ;;  %v252_v41 = vld [vmem:[#allocation6 + $0x48] sm:$0xff]  ;;  %v253_v43 = vld [vmem:[#allocation6 + $0x50] sm:$0xff]  ;;  %v254_v44 = vld [vmem:[#allocation6 + $0x58] sm:$0xff] }
  0x40   :  { %485 = vmatprep.subr.bf16.mxu0 %v591_v1  ;;  %v495_v42 = vpack.c.bf16 %v252_v41, %v251_v40  ;;  %v498_v45 = vpack.c.bf16 %v254_v44, %v253_v43  ;;  %v255_v46 = vld [vmem:[#allocation6 + $0x60] sm:$0xff]  ;;  %v256_v47 = vld [vmem:[#allocation6 + $0x68] sm:$0xff]  ;;  %v343_v49 = vld [vmem:[%s710_s2] ss:$0 sm:$0xff] }
  0x41   :  { %v501_v48 = vpack.c.bf16 %v256_v47, %v255_v46  ;;  %v257_v54 = vld [vmem:[#allocation6 + $0x70] sm:$0xff]  ;;  %v258_v55 = vld [vmem:[#allocation6 + $0x78] sm:$0xff] }
  0x42   :  { %466 = vmatpush3.bf16.msra.mxu1 %v465_v12  ;;  %v504_v56 = vpack.c.bf16 %v258_v55, %v257_v54  ;;  %v345_v57 = vld [vmem:[%s712_s4] ss:$0 sm:$0xff] }
  0x43   :  { %467 = vmatprep.subr.bf16.mxu1 %v591_v1  ;;  %487 = vmatpush3.bf16.msra.mxu0 %v486_v33  ;;  %v346_v62 = vld [vmem:[%s714_s6] ss:$0 sm:$0xff] }
  0x44   :  { %488 = vmatprep.subr.bf16.mxu0 %v591_v1 }
  0x46   :  { %469 = vmatpush3.bf16.msra.mxu1 %v468_v15 }
  0x47   :  { %470 = vmatprep.subr.bf16.mxu1 %v591_v1  ;;  %490 = vmatpush3.bf16.msra.mxu0 %v489_v36 }
  0x48   :  { %491 = vmatprep.subr.bf16.mxu0 %v591_v1 }
  0x4a   :  { %472 = vmatpush3.bf16.msra.mxu1 %v471_v18 }
  0x4b   :  { %473 = vmatprep.subr.bf16.mxu1 %v591_v1  ;;  %493 = vmatpush3.bf16.msra.mxu0 %v492_v39 }
  0x4c   :  { %494 = vmatprep.subr.bf16.mxu0 %v591_v1 }
  0x4e   :  { %475 = vmatpush3.bf16.msra.mxu1 %v474_v21 }
  0x4f   :  { %476 = vmatprep.subr.bf16.mxu1 %v591_v1  ;;  %496 = vmatpush3.bf16.msra.mxu0 %v495_v42 }
  0x50   :  { %497 = vmatprep.subr.bf16.mxu0 %v591_v1 }
  0x52   :  { %478 = vmatpush3.bf16.msra.mxu1 %v477_v24 }
  0x53   :  { %479 = vmatprep.subr.bf16.mxu1 %v591_v1  ;;  %499 = vmatpush3.bf16.msra.mxu0 %v498_v45 }
  0x54   :  { %500 = vmatprep.subr.bf16.mxu0 %v591_v1 }
  0x56   :  { %481 = vmatpush3.bf16.msra.mxu1 %v480_v27 }
  0x57   :  { %502 = vmatpush3.bf16.msra.mxu0 %v501_v48 }
  0x58   :  { %503 = vmatprep.subr.bf16.mxu0 %v591_v1 }
  0x5b   :  { %505 = vmatpush3.bf16.msra.mxu0 %v504_v56 }
 0x10c   :  { %v144_v50 = vpop.f32.mrb[0].mxu0 }
 0x10d   :  { %v145_v51 = vadd.f32 %v343_v49, %v144_v50  ;;  %v387_v52 = vpop.f32.mrb[1].mxu0 }
 0x10f   :  { %v148_v53 = vmax.f32 %v145_v51, 0.0 }
 0x111   :  { %421 = vmatmul.mubr.f32.vlgmr.msra.gmra.mrb[0].mxu1 %v148_v53 }
 0x1e4   :  { %v238_v58 = vpop.f32.mrb[0].mxu1 }
 0x1e5   :  { %v239_v59 = vadd.f32 %v345_v57, %v238_v58  ;;  %v422_v60 = vpop.f32.mrb[1].mxu1 }
 0x1e7   :  { %v242_v61 = vmax.f32 %v239_v59, 0.0 }
 0x1e9   :  { %456 = vmatmul.mubr.f32.vlgmr.msra.gmra.mrb[2].mxu0 %v242_v61 }
 0x2bc   :  { %v332_v63 = vpop.f32.mrb[2].mxu0 }
 0x2bd   :  { %v333_v0 = vadd.f32 %v346_v62, %v332_v63  ;;  %v457_v1 = vpop.f32.mrb[3].mxu0 }
 0x2bf   :  { %336 = vst [vmem:[%s715_s7] sm:$0xff] %v333_v0 }
 0x2c0   :  { %341 = vsyncpa [#allocation3], 1 }
 0x2c1   :  { %342 = vsyncpa [#allocation5], 1 }

</bundles_post_ra>
